<compile_context>
chip_gen: v6e
topology: v6e:2x2x1
jax: 0.10.0
libtpu: 0.0.40
codegen_flags: <defaults>
</compile_context>

<pallas_src>
import jax
import jax.numpy as jnp
from jax.experimental import pallas as pl
from jax.experimental.pallas import tpu as pltpu


# ~8 MiB per block regardless of dtype (dtype-scaled element counts).
_BLOCK_BYTES = 8 << 20
# 2 input + 2 output double-buffers of 8 MiB (=32 MiB) plus headroom; raises
# the v5e (16 MiB) / v6e (32 MiB) scoped defaults and stays under v7x's
# 64 MiB physical VMEM.
_VMEM_LIMIT_BYTES = 48 << 20
# itemsize -> sublane multiple for legal (non-full-extent) row tiles.
_SUBLANE_UNIT = {8: 8, 4: 8, 2: 16, 1: 32}


def _round_down(x, m):
    return max((x // m) * m, m)


def _select_tiles(rows, lanes, itemsize):
    """Pick (tr, tl) tile extents for the 2-D slab.

    Strategy (per perf review):
      * Prefer full-lane-width blocks (tl == lanes): contiguous HBM slabs,
        unmasked lane-dense stores, 1-D grid over rows.
      * Hold each block to ~_BLOCK_BYTES regardless of dtype.
      * Every tile extent is either unit-aligned (boundary blocks are masked by
        Pallas — correct, perf-only) or the full axis extent (exempt from the
        (8,128) divisibility rule), so any shape compiles.
    """
    sub = _SUBLANE_UNIT.get(itemsize, 8)
    row_bytes = lanes * itemsize

    # Whole array fits in one block -> single-step grid.
    if rows * row_bytes <= _BLOCK_BYTES:
        return rows, lanes

    # Full-lane blocks, 1-D grid over rows (preferred path).
    if row_bytes * sub <= _BLOCK_BYTES:
        max_rows = _BLOCK_BYTES // row_bytes
        tr = _round_down(max_rows, sub)      # multiple of `sub`, < rows here
        return tr, lanes

    # Extremely wide rows: fall back to 2-D tiling with a 128-aligned lane tile.
    tr = min(sub, rows)                      # multiple of `sub`, or full extent
    max_lanes = _BLOCK_BYTES // (tr * itemsize)
    tl = min(_round_down(max_lanes, 128), lanes)
    return tr, tl


def _guidance_kernel(x_ref, o_ref):
    # Template body: base-class guidance is a pass-through.  Subclasses replace
    # this with real per-tile guidance compute (VMEM-resident).
    o_ref[...] = x_ref[...]


@jax.jit
def _guidance_forward(image):
    """Identity guidance forward over an NCHW image, tiled for TPU."""
    n, c, h, w = image.shape
    rows, lanes = n * c, h * w
    itemsize = jnp.dtype(image.dtype).itemsize
    tr, tl = _select_tiles(rows, lanes, itemsize)

    # Reshape inside jit: contiguous fold, fuses with the custom call.
    x2d = image.reshape(rows, lanes)

    cost = pl.CostEstimate(
        flops=0,
        transcendentals=0,
        bytes_accessed=2 * rows * lanes * itemsize,
    )

    if tl == lanes:
        # Preferred: contiguous full-lane blocks, 1-D grid over rows.
        grid = (pl.cdiv(rows, tr),)
        in_spec = pl.BlockSpec((tr, lanes), lambda i: (i, 0))
        out_spec = pl.BlockSpec((tr, lanes), lambda i: (i, 0))
        dims = ("parallel",)
    else:
        grid = (pl.cdiv(rows, tr), pl.cdiv(lanes, tl))
        in_spec = pl.BlockSpec((tr, tl), lambda i, j: (i, j))
        out_spec = pl.BlockSpec((tr, tl), lambda i, j: (i, j))
        dims = ("parallel", "parallel")

    out2d = pl.pallas_call(
        _guidance_kernel,
        out_shape=jax.ShapeDtypeStruct((rows, lanes), image.dtype),
        grid=grid,
        in_specs=[in_spec],
        out_specs=out_spec,
        compiler_params=pltpu.CompilerParams(
            dimension_semantics=dims,
            vmem_limit_bytes=_VMEM_LIMIT_BYTES,
        ),
        cost_estimate=cost,
        # NOTE: subclasses that overwrite the image in place (and whose callers
        # donate the input) can add input_output_aliases={0: 0} here to halve
        # peak HBM footprint for large latents.
    )(x2d)
    return out2d.reshape(n, c, h, w)


class BaseGuidancePallas:
    """JAX/Pallas analogue of BaseGuidance (abstract guidance base class)."""

    def __init__(self, cfg=None, identity_fast_path=False):
        self.cfg = cfg
        # Base-class guidance is mathematically a no-op; with the fast path
        # enabled forward() returns the input directly (zero HBM traffic,
        # zero launch overhead).  Keep it off to exercise the kernel template.
        self.identity_fast_path = identity_fast_path
        # No parameters in the reference module's __init__ -> nothing to init.

    def forward(self, image):
        if self.identity_fast_path:
            return image
        return _guidance_forward(image)

    def __call__(self, image):
        return self.forward(image)

    def update(self, step):
        # TODO(synk): abstract in reference (NotImplementedError); no compute.
        pass

    def text2img(self, text):
        # Reference implementation is `pass`.
        pass

    def log(self, writer, step):
        # Reference implementation is `pass`.
        pass


if __name__ == "__main__":
    key = jax.random.PRNGKey(0)
    # Small NCHW image consistent with a guidance forward(image) call.
    image = jax.random.normal(key, (2, 4, 16, 16), dtype=jnp.float32)

    guidance = BaseGuidancePallas(cfg=None)  # fast path off -> kernel runs
    out = jax.block_until_ready(guidance(image))

    assert out.shape == image.shape and out.dtype == image.dtype
    assert bool(jnp.allclose(out, image))
    print("KERNEL_OK")
</pallas_src>

<mosaic_0001>
module attributes {stable_mosaic.version = 11 : i64} {
  func.func @_guidance_kernel(%arg0: i32, %arg1: memref<8x256xf32, #tpu.memory_space<vmem>>, %arg2: memref<8x256xf32, #tpu.memory_space<vmem>>) attributes {dimension_semantics = [#tpu.dimension_semantics<parallel>], iteration_bounds = array<i64: 1>, scalar_prefetch = 0 : i64, scratch_operands = 0 : i64, tpu.core_type = #tpu.core_type<tc>, window_params = [{transform_indices = @transform_0, window_bounds = array<i64: 8, 256>}, {transform_indices = @transform_1, window_bounds = array<i64: 8, 256>}]} {
    %c0 = arith.constant 0 : index
    %c0_0 = arith.constant 0 : index
    %0 = vector.load %arg1[%c0, %c0_0] : memref<8x256xf32, #tpu.memory_space<vmem>>, vector<8x256xf32>
    %c0_1 = arith.constant 0 : index
    %c0_2 = arith.constant 0 : index
    %1 = vector.load %arg2[%c0_1, %c0_2] : memref<8x256xf32, #tpu.memory_space<vmem>>, vector<8x256xf32>
    tpu.vector_store %arg2[%c0_1, %c0_2], %0 {strides = array<i32>} : memref<8x256xf32, #tpu.memory_space<vmem>>, vector<8x256xf32>,
    return
  }
  func.func @transform_0(%arg0: i32) -> (i32, i32) {
    %c0_i32 = arith.constant 0 : i32
    %c0_i32_0 = arith.constant 0 : i32
    return %arg0, %c0_i32 : i32, i32
  }
  func.func @transform_1(%arg0: i32) -> (i32, i32) {
    %c0_i32 = arith.constant 0 : i32
    %c0_i32_0 = arith.constant 0 : i32
    return %arg0, %c0_i32 : i32, i32
  }
}

</mosaic_0001>

<bundles_post_ra>
// kernel: _guidance_forward.1
= control target key start
LH: loop header
LB: loop body
LE: loop exit
PB: predicated region body
PF: predicated region fallthrough
CT: control target
= control target key end

     0   :  { %s38_s0 = inlined_call_operand.vmem [shape: f32[8,256], index: 0, kind: input, shape index: {}]   ;;  %s39_s1 = inlined_call_operand.vmem [shape: f32[8,256], index: 1, kind: output, shape index: {}]  }
   0x1   :  { %v8_v0 = vld [vmem:[%s38_s0] sm:$0xff]  ;;  %v9_v1 = vld [vmem:[%s38_s0 + $0x8] sm:$0xff] }
   0x2   :  { %10 = vst [vmem:[%s39_s1] sm:$0xff] %v8_v0  ;;  %11 = vst [vmem:[%s39_s1 + $0x8] sm:$0xff] %v9_v1 }

</bundles_post_ra>
